<compile_context>
chip_gen: v6e
topology: v6e:2x2x1
jax: 0.10.0
libtpu: 0.0.40
codegen_flags: <defaults>
</compile_context>

<pallas_src>
import math

import jax
import jax.numpy as jnp
from jax.experimental import pallas as pl
from jax.experimental.pallas import tpu as pltpu


# Explicit scoped-VMEM limit: v5e/v6e have 128 MiB physical VMEM, v7x has 64 MiB,
# so 48 MiB is safe everywhere and leaves 16 MiB headroom on v7x.
_VMEM_LIMIT_BYTES = 48 * 1024 * 1024
# Budget for all pipelined tile copies together (x, out, pe, double-buffered).
_VMEM_TILE_BUDGET_BYTES = 30 * 1024 * 1024


def make_positional_encoding(dim: int, max_seq_length: int) -> jnp.ndarray:
    """Deterministic buffer init, mirroring the PyTorch __init__ verbatim.

    NOTE: the reference module applies exp() BEFORE the (-log(10000)/dim)
    scaling:  div_term = exp(arange(0, dim, 2)) * (-log(10000)/dim).
    This is not the standard sinusoidal encoding (it overflows float32 for
    dim >~ 178), but it is exactly what the spec computes, so it is reproduced.
    """
    position = jnp.arange(0, max_seq_length, dtype=jnp.float32)[:, None]      # (S_max, 1)
    div_term = jnp.exp(jnp.arange(0, dim, 2).astype(jnp.float32)) * (
        -math.log(10000.0) / dim
    )                                                                          # (D//2,)
    pe = jnp.zeros((max_seq_length, dim), dtype=jnp.float32)
    pe = pe.at[:, 0::2].set(jnp.sin(position * div_term))
    pe = pe.at[:, 1::2].set(jnp.cos(position * div_term))
    return pe                                                                  # (S_max, D)


def _add_pe_kernel(x_ref, pe_ref, o_ref):
    # Identical 2-D tiles (batch dim squeezed away).  The add promotes
    # (e.g. bf16 + f32 -> f32) on the VPU, matching PyTorch's `x + pe`.
    o_ref[...] = (x_ref[...] + pe_ref[...]).astype(o_ref.dtype)


def _sublane(*dtypes) -> int:
    # Minimal second-to-last tile dim: 8 for f32, 16 for bf16, 32 for int8/fp8.
    return max(max(8, 32 // jnp.dtype(d).itemsize) for d in dtypes)


def _choose_tile(n: int, per_unit_bytes: int, sublane: int) -> int:
    """Tile length along the pipelined axis.

    Returns either the full extent `n` or a sublane-aligned length that fits
    the VMEM tile budget.  Callers use a cdiv grid, so the tile does not have
    to divide `n` (Pallas masks the ragged final block)."""
    max_units = max(sublane, _VMEM_TILE_BUDGET_BYTES // per_unit_bytes)
    if n <= max_units:
        return n  # full extent is always a legal block
    best = None
    t = sublane
    while t <= max_units:
        if n % t == 0:
            best = t
        t += sublane
    if best is not None:
        return best  # largest dividing sublane multiple within budget
    # No dividing sublane multiple fits: sublane-aligned tile + cdiv grid.
    return (max_units // sublane) * sublane


def _min_pipeline_steps(n: int, tile: int, sublane: int) -> int:
    """With B == 1, keep >= 8 grid steps (>= 4 per TensorCore on v7x) so the
    input prefetch / output writeback DMAs overlap compute."""
    min_steps = 8
    if pl.cdiv(n, tile) < min_steps and n >= min_steps * sublane:
        tile = max(sublane, (n // min_steps) // sublane * sublane)
    return tile


def _compiler_params():
    return pltpu.CompilerParams(
        dimension_semantics=("parallel", "parallel"),
        vmem_limit_bytes=_VMEM_LIMIT_BYTES,
    )


def _pallas_add_lane_dense(x, pe, out_dtype, donate_x):
    """Lane-dense path: requires (S*D) % 128 == 0."""
    B, S, D = x.shape
    n_rows = (S * D) // 128
    sublane = _sublane(x.dtype, pe.dtype, out_dtype)

    per_row_bytes = 2 * 128 * (
        x.dtype.itemsize + jnp.dtype(out_dtype).itemsize + pe.dtype.itemsize
    )
    tr = _choose_tile(n_rows, per_row_bytes, sublane)
    if B == 1:
        tr = _min_pipeline_steps(n_rows, tr, sublane)

    xr = x.reshape(B, n_rows, 128)  # free row-major bitcast

    pe_rows_total = (pe.shape[0] * D) // 128
    if (pe.shape[0] * D) % 128 == 0 and (tr % sublane == 0 or tr == pe_rows_total):
        # Whole pe buffer is lane-dense and the block shape is legal against its
        # full extent: skip the pe[:S] slice pass entirely (the grid only ever
        # touches the first n_rows rows of pe).
        per = pe.reshape(pe_rows_total, 128)
    else:
        per = pe[:S].reshape(n_rows, 128)

    grid = (pl.cdiv(n_rows, tr), B)  # batch innermost => pe DMA'd once per row tile

    aliases = {}
    if donate_x and jnp.dtype(out_dtype) == x.dtype:
        aliases = {0: 0}  # write the result in place of (donated) x

    out = pl.pallas_call(
        _add_pe_kernel,
        out_shape=jax.ShapeDtypeStruct((B, n_rows, 128), out_dtype),
        grid_spec=pltpu.PrefetchScalarGridSpec(
            num_scalar_prefetch=0,
            grid=grid,
            in_specs=[
                pl.BlockSpec((pl.Squeezed(), tr, 128), lambda r, b: (b, r, 0)),
                pl.BlockSpec((tr, 128), lambda r, b: (r, 0)),
            ],
            out_specs=pl.BlockSpec((pl.Squeezed(), tr, 128), lambda r, b: (b, r, 0)),
        ),
        compiler_params=_compiler_params(),
        input_output_aliases=aliases,
    )(xr, per)
    return out.reshape(B, S, D)


def _pallas_add_3d(x, pe, out_dtype, donate_x):
    """Fallback when S*D is not a multiple of 128.  D stays the lane dim, so
    stores may be masked if D is not a multiple of 128."""
    # TODO(synk): padding D up to 128 in the wrapper would trade masked stores
    # for two extra full pad/slice HBM passes -- not worth it for a single add.
    B, S, D = x.shape
    sublane = _sublane(x.dtype, pe.dtype, out_dtype)
    per_row_bytes = 2 * D * (
        x.dtype.itemsize + jnp.dtype(out_dtype).itemsize + pe.dtype.itemsize
    )
    ts = _choose_tile(S, per_row_bytes, sublane)
    if B == 1:
        ts = _min_pipeline_steps(S, ts, sublane)

    pe_s = pe[:S]
    grid = (pl.cdiv(S, ts), B)

    aliases = {}
    if donate_x and jnp.dtype(out_dtype) == x.dtype:
        aliases = {0: 0}

    return pl.pallas_call(
        _add_pe_kernel,
        out_shape=jax.ShapeDtypeStruct((B, S, D), out_dtype),
        grid_spec=pltpu.PrefetchScalarGridSpec(
            num_scalar_prefetch=0,
            grid=grid,
            in_specs=[
                pl.BlockSpec((pl.Squeezed(), ts, D), lambda s, b: (b, s, 0)),
                pl.BlockSpec((ts, D), lambda s, b: (s, 0)),
            ],
            out_specs=pl.BlockSpec((pl.Squeezed(), ts, D), lambda s, b: (b, s, 0)),
        ),
        compiler_params=_compiler_params(),
        input_output_aliases=aliases,
    )(x, pe_s)


def _positional_encoder_pallas(x, pe, donate_x=False):
    """Pallas forward: x (B,S,D) + pe[:S] broadcast over batch."""
    B, S, D = x.shape
    out_dtype = jnp.result_type(x.dtype, pe.dtype)  # PyTorch-style promotion
    if (S * D) % 128 == 0:
        return _pallas_add_lane_dense(x, pe, out_dtype, donate_x)
    return _pallas_add_3d(x, pe, out_dtype, donate_x)


def positional_encoder_forward(x, pe, *, min_pallas_elements: int = 1 << 15,
                               donate_x: bool = False):
    """Public wrapper: routes tiny problems to a plain fused add (per-grid-step
    overhead would dominate a custom kernel there), larger ones to Pallas."""
    if x.size < min_pallas_elements:
        return x + pe[None, :x.shape[1]]
    return _positional_encoder_pallas(x, pe, donate_x=donate_x)


if __name__ == "__main__":
    # Small shapes consistent with the module: dim=32, max_seq_length=16, x=(2, 8, 32)
    dim = 32
    max_seq_length = 16
    B, S = 2, 8

    key = jax.random.PRNGKey(0)
    k0, k1, k2, k3 = jax.random.split(key, 4)
    pe = make_positional_encoding(dim, max_seq_length)

    # 1) Lane-dense Pallas path (S*D = 256 is a multiple of 128), f32 x.
    x = jax.random.normal(k0, (B, S, dim), dtype=jnp.float32)
    out = jax.block_until_ready(jax.jit(_positional_encoder_pallas)(x, pe))
    ref = x + pe[None, :S, :]
    assert out.shape == ref.shape and out.dtype == ref.dtype
    assert jnp.allclose(out, ref, atol=1e-6, rtol=1e-6)

    # 2) B == 1 path: row axis split into >= 8 pipelined tiles (batch-innermost grid).
    pe_big = make_positional_encoding(64, 512)
    x1 = jax.random.normal(k1, (1, 512, 64), dtype=jnp.float32)
    out1 = jax.block_until_ready(jax.jit(_positional_encoder_pallas)(x1, pe_big))
    assert jnp.allclose(out1, x1 + pe_big[None, :512, :], atol=1e-6, rtol=1e-6)

    # 3) 3-D fallback (S*D not a multiple of 128 -> masked stores).
    pe_small = make_positional_encoding(20, 16)
    x2 = jax.random.normal(k2, (2, 7, 20), dtype=jnp.float32)
    out2 = jax.block_until_ready(jax.jit(_positional_encoder_pallas)(x2, pe_small))
    assert jnp.allclose(out2, x2 + pe_small[None, :7, :], atol=1e-6, rtol=1e-6)

    # 4) Dtype promotion matches PyTorch: bf16 x + f32 pe -> f32 out.
    xb = jax.random.normal(k3, (B, S, dim), dtype=jnp.bfloat16)
    outb = jax.block_until_ready(jax.jit(_positional_encoder_pallas)(xb, pe))
    refb = xb + pe[None, :S, :]
    assert outb.dtype == refb.dtype == jnp.float32
    assert jnp.allclose(outb, refb, atol=1e-6, rtol=1e-6)

    # Public wrapper (small-shape fast path) must agree as well.
    out_w = jax.block_until_ready(positional_encoder_forward(x, pe))
    assert jnp.allclose(out_w, ref, atol=1e-6, rtol=1e-6)

    print("KERNEL_OK")
</pallas_src>

<mosaic_0001>
module attributes {stable_mosaic.version = 11 : i64} {
  func.func @_add_pe_kernel(%arg0: i32, %arg1: i32, %arg2: memref<1x2x128xf32, #tpu.memory_space<vmem>>, %arg3: memref<2x128xf32, #tpu.memory_space<vmem>>, %arg4: memref<1x2x128xf32, #tpu.memory_space<vmem>>) attributes {dimension_semantics = [#tpu.dimension_semantics<parallel>, #tpu.dimension_semantics<parallel>], iteration_bounds = array<i64: 1, 2>, scalar_prefetch = 0 : i64, scratch_operands = 0 : i64, tpu.core_type = #tpu.core_type<tc>, window_params = [{transform_indices = @transform_0, window_bounds = array<i64: 1, 2, 128>}, {transform_indices = @transform_1, window_bounds = array<i64: 2, 128>}, {transform_indices = @transform_2, window_bounds = array<i64: 1, 2, 128>}]} {
    %c0 = arith.constant 0 : index
    %c0_0 = arith.constant 0 : index
    %c0_1 = arith.constant 0 : index
    %0 = vector.load %arg2[%c0, %c0_0, %c0_1] : memref<1x2x128xf32, #tpu.memory_space<vmem>>, vector<1x2x128xf32>
    %1 = vector.shape_cast %0 : vector<1x2x128xf32> to vector<2x128xf32>
    %c0_2 = arith.constant 0 : index
    %c0_3 = arith.constant 0 : index
    %2 = vector.load %arg3[%c0_2, %c0_3] : memref<2x128xf32, #tpu.memory_space<vmem>>, vector<2x128xf32>
    %3 = arith.addf %1, %2 : vector<2x128xf32>
    %c0_4 = arith.constant 0 : index
    %c0_5 = arith.constant 0 : index
    %c0_6 = arith.constant 0 : index
    %4 = vector.load %arg4[%c0_4, %c0_5, %c0_6] : memref<1x2x128xf32, #tpu.memory_space<vmem>>, vector<1x2x128xf32>
    %5 = vector.shape_cast %4 : vector<1x2x128xf32> to vector<2x128xf32>
    %6 = vector.shape_cast %3 : vector<2x128xf32> to vector<1x2x128xf32>
    tpu.vector_store %arg4[%c0_4, %c0_5, %c0_6], %6 {strides = array<i32>} : memref<1x2x128xf32, #tpu.memory_space<vmem>>, vector<1x2x128xf32>,
    return
  }
  func.func @transform_0(%arg0: i32, %arg1: i32) -> (i32, i32, i32) {
    %c0_i32 = arith.constant 0 : i32
    %c0_i32_0 = arith.constant 0 : i32
    return %arg1, %arg0, %c0_i32 : i32, i32, i32
  }
  func.func @transform_1(%arg0: i32, %arg1: i32) -> (i32, i32) {
    %c0_i32 = arith.constant 0 : i32
    %c0_i32_0 = arith.constant 0 : i32
    return %arg0, %c0_i32 : i32, i32
  }
  func.func @transform_2(%arg0: i32, %arg1: i32) -> (i32, i32, i32) {
    %c0_i32 = arith.constant 0 : i32
    %c0_i32_0 = arith.constant 0 : i32
    return %arg1, %arg0, %c0_i32 : i32, i32, i32
  }
}

</mosaic_0001>

<bundles_post_ra>
// kernel: _positional_encoder_pallas.1
= control target key start
LH: loop header
LB: loop body
LE: loop exit
PB: predicated region body
PF: predicated region fallthrough
CT: control target
= control target key end

     0   :  { %s354_s9 = smov 0   ;;  %s331_s10 = smov 0   ;;  %s368_s0 = inlined_call_operand.vmem [shape: f32[2,2,128], index: 0, kind: input, shape index: {}]   ;;  %s369_s1 = inlined_call_operand.vmem [shape: f32[2,128], index: 1, kind: input, shape index: {}]   ;;  %s370_s2 = inlined_call_operand.vmem [shape: f32[2,2,128], index: 2, kind: output, shape index: {}]  }
   0x1   :  { %s335_s11 = smov 0  }
   0x2 LB: > { %s21_s12 = sadd.s32 1, %s333_s10  ;;  %p286_p0 = scmp.ge.s32.totalorder %s337_s11, 1  ;;  %s337_s11 = sphi %s335_s11, %s12_s11   ;;  %s333_s10 = sphi %s331_s10, %s332_s10   ;;  %s329_s9 = sphi %s354_s9, %s371_s9  }
   0x3   : > { %p22_p1 = scmp.ge.s32.totalorder %s21_s12, 2  ;;  %p139_p2 = scmp.lt.s32.totalorder %s337_s11, 3 }
   0x5   : > { %s373_s12 = smov (%p22_p1, %s21_s12), 0  ;;  %p140_p3 = pnand %p286_p0, %p139_p2 }
   0x6   : > { %p169_p4 = scmp.lt.s32.totalorder (!%p140_p3), %s329_s9, 1 }
   0x7   : > { %143 = sbr.rel (%p140_p3) target bundleno = 19 (0x13), region = 28 }
   0xc   : > { %s375_s9 = smov (!%p169_p4, %s329_s9), 1  ;;  %v188_v0 = vld [vmem:[%s369_s1] sm:$0x3] }
   0xd   : > { %s287_s13 = sshll.u32 %s375_s9, 1 }
   0xe   : > { %s175_s18 = scalar_lea.vmem %s368_s0, %s287_s13  ;;  %s186_s21 = scalar_lea.vmem %s370_s2, %s287_s13 }
   0xf   : > { %v187_v1 = vld [vmem:[%s175_s18] sm:$0x3] }
  0x10   : > { %v189_v2 = vadd.f32 %v188_v0, %v187_v1 }
  0x12   : > { %190 = vst [vmem:[%s186_s21] sm:$0x3] %v189_v2 }
  0x13 PF: > { %s12_s11 = sadd.s32 1, %s337_s11   ;;  %s371_s9 = smov %s333_s10 }
  0x14   : > { %p9_p5 = scmp.ge.s32.totalorder %s12_s11, 4   ;;  %s332_s10 = smov %s373_s12  }
  0x16   :  { %11 = sbr.rel (!%p9_p5) target bundleno = 2 (0x2), region = 61 }

</bundles_post_ra>
